<compile_context>
chip_gen: v7x
topology: tpu7x:2x2x1
jax: 0.10.0
libtpu: 0.0.40
codegen_flags: <defaults>
</compile_context>

<pallas_src>
import jax
import jax.numpy as jnp
from jax.experimental import pallas as pl
from jax.experimental.pallas import tpu as pltpu

SMOOTH = 1e-5


def _round_up(x, m):
    return ((x + m - 1) // m) * m


def _vmem_limit_bytes():
    """Per-generation scoped-VMEM budget: ~3/4 of physical VMEM, capped at
    96 MiB (v5e/v6e have 128 MiB physical, v7x only 64 MiB -> 48 MiB here)."""
    cap = 64 << 20
    try:
        cap = int(getattr(pltpu.get_tpu_info(), "vmem_capacity_bytes", cap))
    except Exception:
        pass
    return int(min(96 << 20, (cap * 3) // 4))


def _pick_spatial_tile(S2, C, itemsize, vmem_limit):
    """Spatial tile in rows of 128 lanes.  Sized so that the double-buffered
    (logits + int8 labels) blocks plus ~5 full-size f32 in-kernel temporaries
    (x, e, inv, masks, masked products) stay within ~60% of the VMEM limit.
    When tiling, TS2 is a multiple of 32 so f32 / bf16 / int8 block tilings are
    all legal; small inputs use a single full-extent block (no row padding)."""
    per_row = 2 * (C * 128 * itemsize + 128 * 1) + 5 * C * 128 * 4
    ts = int(vmem_limit * 0.6) // per_row
    ts = max(32, min(ts, 2048))
    ts = (ts // 32) * 32
    if S2 <= ts:
        return S2
    return ts


def _make_kernel(C, TS2, SUB, needs_mask):
    """Grid = (head, batch, spatial_tile).

    logits_ref : [C, TS2, 128]   (head & batch dims squeezed by BlockSpec)
    labels_ref : [TS2, 128]      int8/int32 class ids (-1 = padded pixel)
    out_ref    : [1, 1, 8, 128]  per-(head,batch) loss, written at last tile
    inter/psum/tsum_ref : [C, SUB, 128] f32 partial sums across spatial tiles
    """

    def kernel(logits_ref, labels_ref, out_ref, inter_ref, psum_ref, tsum_ref):
        s = pl.program_id(2)
        ns = pl.num_programs(2)

        @pl.when(s == 0)
        def _():
            inter_ref[...] = jnp.zeros_like(inter_ref)
            psum_ref[...] = jnp.zeros_like(psum_ref)
            tsum_ref[...] = jnp.zeros_like(tsum_ref)

        x = logits_ref[...].astype(jnp.float32)        # [C, TS2, 128]
        lab = labels_ref[...].astype(jnp.int32)        # [TS2, 128]

        # Channel softmax: C is a leading (un-tiled) axis, so max/sum are
        # elementwise combines across C spatial slabs (pure VPU + EUP exp).
        m = jnp.max(x, axis=0, keepdims=True)
        e = jnp.exp(x - m)
        den = jnp.sum(e, axis=0)                       # [TS2, 128]
        inv = pl.reciprocal(den, approx=True)          # EUP slot
        inv = inv * (2.0 - den * inv)                  # Newton step -> ~1e-8

        if needs_mask:
            valid = lab >= 0                           # padded pixels are -1

        def tile_fold(v):
            # [TS2,128] -> [SUB,128] with no cross-lane (XLU) work when SUB==8.
            if SUB == 8:
                return v.reshape(TS2 // 8, 8, 128).sum(axis=0)
            return jnp.sum(v, axis=0, keepdims=True)
            # NOTE: if VALU ever saturates (bf16 logits / v7x), these sums can
            # be offloaded to the idle MXU via a dot with a ones vector.

        for c in range(C):                             # static unroll over C
            p_c = e[c] * inv                           # [TS2, 128]
            hit = lab == c                             # never true for padding
            p_sum = jnp.where(valid, p_c, 0.0) if needs_mask else p_c
            inter_ref[c] += tile_fold(jnp.where(hit, p_c, 0.0))
            psum_ref[c] += tile_fold(p_sum)
            tsum_ref[c] += tile_fold(hit.astype(jnp.float32))

        @pl.when(s == ns - 1)
        def _():
            # Single small cross-lane reduce per (head, batch), deferred here.
            inter = jnp.sum(jnp.sum(inter_ref[...], axis=2), axis=1,
                            keepdims=True)             # [C, 1]
            psum = jnp.sum(jnp.sum(psum_ref[...], axis=2), axis=1,
                           keepdims=True)
            tsum = jnp.sum(jnp.sum(tsum_ref[...], axis=2), axis=1,
                           keepdims=True)
            dice = (2.0 * inter + SMOOTH) / (psum + tsum + SMOOTH)
            loss = jnp.mean(1.0 - dice)                # mean over channels
            out_ref[...] = jnp.broadcast_to(loss, (1, 1, 8, 128))

    return kernel


def deep_dice_loss(logits, target, deep_supervision=True, deep_supr_num=2):
    """logits: [B, NH, C, H, W] if deep_supervision else [B, C, H, W]
       target: int class labels [B, H, W] or dense one-hot [B, C, H, W]."""
    if deep_supervision:
        B, NH, C, H, W = logits.shape
        assert NH == deep_supr_num + 1
        logits_r = logits
    else:
        # num_heads == 0 path: single dice_loss(logits, target); identical to
        # running the same kernel with a singleton head axis.
        B, C, H, W = logits.shape
        NH = 1
        logits_r = logits[:, None]

    S = H * W

    # Kernel consumes integer class labels (int8 when C fits): ~4*C x less
    # target HBM traffic than a dense f32 one-hot.
    # TODO(synk): soft / multi-label dense targets are not representable as
    # class labels; they would need a dense-target variant of this kernel.
    if target.ndim == 4:
        labels = jnp.argmax(target, axis=1)
    else:
        labels = target
    lab_dtype = jnp.int8 if C <= 127 else jnp.int32
    labels = labels.astype(lab_dtype).reshape(B, S)

    itemsize = jnp.dtype(logits.dtype).itemsize
    vmem_limit = _vmem_limit_bytes()
    S2 = pl.cdiv(S, 128)
    TS2 = _pick_spatial_tile(S2, C, itemsize, vmem_limit)
    SUB = 8 if TS2 % 8 == 0 else 1
    S2p = _round_up(S2, TS2)
    S_pad = S2p * 128
    NS = S2p // TS2
    needs_mask = S_pad != S

    logits_flat = logits_r.reshape(B, NH, C, S)
    if needs_mask:
        pad = S_pad - S
        logits_flat = jnp.pad(logits_flat, ((0, 0), (0, 0), (0, 0), (0, pad)))
        labels = jnp.pad(labels, ((0, 0), (0, pad)), constant_values=-1)
    logits_r = logits_flat.reshape(B, NH, C, S2p, 128)
    labels = labels.reshape(B, S2p, 128)

    kernel = _make_kernel(C, TS2, SUB, needs_mask)

    out = pl.pallas_call(
        kernel,
        out_shape=jax.ShapeDtypeStruct((NH, B, 8, 128), jnp.float32),
        grid_spec=pltpu.PrefetchScalarGridSpec(
            num_scalar_prefetch=0,
            # Heads and batch are independent ("parallel": megacore sharding);
            # spatial tiles accumulate into scratch ("arbitrary", innermost).
            grid=(NH, B, NS),
            in_specs=[
                # batch + head dims squeezed -> kernel sees [C, TS2, 128]
                pl.BlockSpec((None, None, C, TS2, 128),
                             lambda h, b, s: (b, h, 0, s, 0)),
                # integer labels -> kernel sees [TS2, 128]
                pl.BlockSpec((None, TS2, 128), lambda h, b, s: (b, s, 0)),
            ],
            # Lane-dense (8,128) tile per (head, batch); written once at the
            # last spatial tile, scalar extracted in the wrapper.
            out_specs=pl.BlockSpec((1, 1, 8, 128), lambda h, b, s: (h, b, 0, 0)),
            scratch_shapes=[pltpu.VMEM((C, SUB, 128), jnp.float32)] * 3,
        ),
        compiler_params=pltpu.CompilerParams(
            dimension_semantics=("parallel", "parallel", "arbitrary"),
            vmem_limit_bytes=vmem_limit,
        ),
    )(logits_r, labels)

    # AverageMeter with n=1  ==  plain mean over heads; the batch mean commutes
    # with it because every (b, c) is weighted equally in the per-head mean.
    return jnp.mean(out[:, :, 0, 0])


def _reference(logits, target, deep_supervision=True, deep_supr_num=2):
    """Pure-JAX reference mirroring the PyTorch forward."""
    def dice(x, t):
        b, c = x.shape[:2]
        x = x.reshape(b, c, -1)
        t = t.reshape(b, c, -1)
        p = jax.nn.softmax(x, axis=1)
        inter = jnp.sum(p * t, axis=-1)
        d = (2.0 * inter + SMOOTH) / (jnp.sum(p, -1) + jnp.sum(t, -1) + SMOOTH)
        return jnp.mean(1.0 - d)

    if not deep_supervision:
        return dice(logits, target)
    nh = deep_supr_num + 1
    return jnp.mean(jnp.stack([dice(logits[:, h], target) for h in range(nh)]))


if __name__ == "__main__":
    key = jax.random.PRNGKey(0)
    B, C, H, W = 2, 4, 16, 16
    deep_supr_num = 2
    NH = deep_supr_num + 1

    k1, k2, k3, k4 = jax.random.split(key, 4)
    logits = jax.random.normal(k1, (B, NH, C, H, W), dtype=jnp.float32)
    labels = jax.random.randint(k2, (B, H, W), 0, C, dtype=jnp.int32)
    target = jnp.transpose(jax.nn.one_hot(labels, C, dtype=jnp.float32),
                           (0, 3, 1, 2))                     # NCHW one-hot

    ref = _reference(logits, target, True, deep_supr_num)

    # 1) integer-label target path (preferred).
    loss = jax.block_until_ready(
        deep_dice_loss(logits, labels, True, deep_supr_num))
    assert jnp.allclose(loss, ref, atol=1e-5, rtol=1e-5), (loss, ref)

    # 2) dense one-hot target path (module interface).
    loss2 = jax.block_until_ready(
        deep_dice_loss(logits, target, True, deep_supr_num))
    assert jnp.allclose(loss2, ref, atol=1e-5, rtol=1e-5), (loss2, ref)

    # 3) num_heads == 0 path (no deep supervision).
    ref3 = _reference(logits[:, 0], target, deep_supervision=False)
    loss3 = jax.block_until_ready(
        deep_dice_loss(logits[:, 0], target, deep_supervision=False))
    assert jnp.allclose(loss3, ref3, atol=1e-5, rtol=1e-5), (loss3, ref3)

    # 4) ragged spatial size (H*W not a multiple of 128 -> padded + masked).
    Hr = Wr = 12
    logits_rg = jax.random.normal(k3, (B, NH, C, Hr, Wr), dtype=jnp.float32)
    labels_rg = jax.random.randint(k4, (B, Hr, Wr), 0, C, dtype=jnp.int32)
    target_rg = jnp.transpose(jax.nn.one_hot(labels_rg, C, dtype=jnp.float32),
                              (0, 3, 1, 2))
    ref4 = _reference(logits_rg, target_rg, True, deep_supr_num)
    loss4 = jax.block_until_ready(
        deep_dice_loss(logits_rg, labels_rg, True, deep_supr_num))
    assert jnp.allclose(loss4, ref4, atol=1e-5, rtol=1e-5), (loss4, ref4)

    # 5) bf16 logits path (halves the dominant HBM stream; looser tolerance).
    loss5 = jax.block_until_ready(
        deep_dice_loss(logits.astype(jnp.bfloat16), labels, True,
                       deep_supr_num))
    assert jnp.allclose(loss5, ref, atol=2e-2, rtol=2e-2), (loss5, ref)

    print("KERNEL_OK")
</pallas_src>

<mosaic_0001>
module attributes {stable_mosaic.version = 11 : i64} {
  func.func @kernel(%arg0: i32, %arg1: i32, %arg2: i32, %arg3: memref<1x1x4x2x128xf32, #tpu.memory_space<vmem>>, %arg4: memref<1x2x128xi8, #tpu.memory_space<vmem>>, %arg5: memref<1x1x8x128xf32, #tpu.memory_space<vmem>>, %arg6: memref<4x1x128xf32, #tpu.memory_space<vmem>>, %arg7: memref<4x1x128xf32, #tpu.memory_space<vmem>>, %arg8: memref<4x1x128xf32, #tpu.memory_space<vmem>>) attributes {dimension_semantics = [#tpu.dimension_semantics<parallel>, #tpu.dimension_semantics<parallel>, #tpu.dimension_semantics<arbitrary>], iteration_bounds = array<i64: 3, 2, 1>, scalar_prefetch = 0 : i64, scratch_operands = 3 : i64, tpu.core_type = #tpu.core_type<tc>, window_params = [{transform_indices = @transform_0, window_bounds = array<i64: 1, 1, 4, 2, 128>}, {transform_indices = @transform_1, window_bounds = array<i64: 1, 2, 128>}, {transform_indices = @transform_2, window_bounds = array<i64: 1, 1, 8, 128>}]} {
    %c0_i32 = arith.constant 0 : i32
    %0 = arith.cmpi eq, %arg2, %c0_i32 : i32
    %1 = arith.extui %0 : i1 to i32
    %c0_i32_0 = arith.constant 0 : i32
    %2 = arith.cmpi ne, %1, %c0_i32_0 : i32
    scf.if %2 {
      %cst_98 = arith.constant 0.000000e+00 : f32
      %154 = vector.broadcast %cst_98 : f32 to vector<4x1x128xf32>
      %c0_99 = arith.constant 0 : index
      %c0_100 = arith.constant 0 : index
      %c0_101 = arith.constant 0 : index
      %155 = vector.load %arg6[%c0_99, %c0_100, %c0_101] : memref<4x1x128xf32, #tpu.memory_space<vmem>>, vector<4x1x128xf32>
      tpu.vector_store %arg6[%c0_99, %c0_100, %c0_101], %154 {strides = array<i32>} : memref<4x1x128xf32, #tpu.memory_space<vmem>>, vector<4x1x128xf32>,
      %cst_102 = arith.constant 0.000000e+00 : f32
      %156 = vector.broadcast %cst_102 : f32 to vector<4x1x128xf32>
      %c0_103 = arith.constant 0 : index
      %c0_104 = arith.constant 0 : index
      %c0_105 = arith.constant 0 : index
      %157 = vector.load %arg7[%c0_103, %c0_104, %c0_105] : memref<4x1x128xf32, #tpu.memory_space<vmem>>, vector<4x1x128xf32>
      tpu.vector_store %arg7[%c0_103, %c0_104, %c0_105], %156 {strides = array<i32>} : memref<4x1x128xf32, #tpu.memory_space<vmem>>, vector<4x1x128xf32>,
      %cst_106 = arith.constant 0.000000e+00 : f32
      %158 = vector.broadcast %cst_106 : f32 to vector<4x1x128xf32>
      %c0_107 = arith.constant 0 : index
      %c0_108 = arith.constant 0 : index
      %c0_109 = arith.constant 0 : index
      %159 = vector.load %arg8[%c0_107, %c0_108, %c0_109] : memref<4x1x128xf32, #tpu.memory_space<vmem>>, vector<4x1x128xf32>
      tpu.vector_store %arg8[%c0_107, %c0_108, %c0_109], %158 {strides = array<i32>} : memref<4x1x128xf32, #tpu.memory_space<vmem>>, vector<4x1x128xf32>,
    } else {
    }
    %c0 = arith.constant 0 : index
    %c0_1 = arith.constant 0 : index
    %c0_2 = arith.constant 0 : index
    %c0_3 = arith.constant 0 : index
    %c0_4 = arith.constant 0 : index
    %3 = vector.load %arg3[%c0, %c0_1, %c0_2, %c0_3, %c0_4] : memref<1x1x4x2x128xf32, #tpu.memory_space<vmem>>, vector<1x1x4x2x128xf32>
    %4 = vector.shape_cast %3 : vector<1x1x4x2x128xf32> to vector<4x2x128xf32>
    %c0_5 = arith.constant 0 : index
    %c0_6 = arith.constant 0 : index
    %c0_7 = arith.constant 0 : index
    %5 = vector.load %arg4[%c0_5, %c0_6, %c0_7] : memref<1x2x128xi8, #tpu.memory_space<vmem>>, vector<1x2x128xi8>
    %6 = vector.shape_cast %5 : vector<1x2x128xi8> to vector<2x128xi8>
    %7 = arith.extsi %6 : vector<2x128xi8> to vector<2x128xi32>
    %cst = arith.constant dense<0xFF800000> : vector<2x128xf32>
    %8 = vector.multi_reduction <maximumf>, %4, %cst [0] : vector<4x2x128xf32> to vector<2x128xf32>
    %9 = vector.shape_cast %8 : vector<2x128xf32> to vector<1x2x128xf32>
    %10 = vector.broadcast %9 : vector<1x2x128xf32> to vector<4x2x128xf32>
    %11 = arith.subf %4, %10 : vector<4x2x128xf32>
    %12 = math.exp %11 : vector<4x2x128xf32>
    %cst_8 = arith.constant dense<0.000000e+00> : vector<2x128xf32>
    %13 = vector.multi_reduction <add>, %12, %cst_8 [0] : vector<4x2x128xf32> to vector<2x128xf32>
    %14 = tpu.reciprocal %13 {approx = true} : vector<2x128xf32> -> vector<2x128xf32>
    %15 = arith.mulf %13, %14 : vector<2x128xf32>
    %cst_9 = arith.constant 2.000000e+00 : f32
    %16 = vector.broadcast %cst_9 : f32 to vector<2x128xf32>
    %17 = arith.subf %16, %15 : vector<2x128xf32>
    %18 = arith.mulf %14, %17 : vector<2x128xf32>
    %19 = vector.extract_strided_slice %12 {offsets = [0, 0, 0], sizes = [1, 2, 128], strides = [1, 1, 1]} : vector<4x2x128xf32> to vector<1x2x128xf32>
    %20 = vector.shape_cast %19 : vector<1x2x128xf32> to vector<2x128xf32>
    %21 = arith.mulf %20, %18 : vector<2x128xf32>
    %c0_i32_10 = arith.constant 0 : i32
    %22 = vector.broadcast %c0_i32_10 : i32 to vector<2x128xi32>
    %23 = arith.cmpi eq, %7, %22 : vector<2x128xi32>
    %c0_11 = arith.constant 0 : index
    %c0_12 = arith.constant 0 : index
    %c0_13 = arith.constant 0 : index
    %24 = vector.load %arg6[%c0_11, %c0_12, %c0_13] : memref<4x1x128xf32, #tpu.memory_space<vmem>>, vector<1x1x128xf32>
    %25 = vector.shape_cast %24 : vector<1x1x128xf32> to vector<1x128xf32>
    %cst_14 = arith.constant 0.000000e+00 : f32
    %26 = vector.broadcast %cst_14 : f32 to vector<2x128xf32>
    %27 = arith.select %23, %21, %26 : vector<2x128xi1>, vector<2x128xf32>
    %cst_15 = arith.constant dense<0.000000e+00> : vector<128xf32>
    %28 = vector.multi_reduction <add>, %27, %cst_15 [0] : vector<2x128xf32> to vector<128xf32>
    %29 = vector.shape_cast %28 : vector<128xf32> to vector<1x128xf32>
    %30 = arith.addf %25, %29 : vector<1x128xf32>
    %c0_16 = arith.constant 0 : index
    %c0_17 = arith.constant 0 : index
    %c0_18 = arith.constant 0 : index
    %31 = vector.load %arg6[%c0_16, %c0_17, %c0_18] : memref<4x1x128xf32, #tpu.memory_space<vmem>>, vector<1x1x128xf32>
    %32 = vector.shape_cast %31 : vector<1x1x128xf32> to vector<1x128xf32>
    %33 = vector.shape_cast %30 : vector<1x128xf32> to vector<1x1x128xf32>
    tpu.vector_store %arg6[%c0_16, %c0_17, %c0_18], %33 {strides = array<i32>} : memref<4x1x128xf32, #tpu.memory_space<vmem>>, vector<1x1x128xf32>,
    %c0_19 = arith.constant 0 : index
    %c0_20 = arith.constant 0 : index
    %c0_21 = arith.constant 0 : index
    %34 = vector.load %arg7[%c0_19, %c0_20, %c0_21] : memref<4x1x128xf32, #tpu.memory_space<vmem>>, vector<1x1x128xf32>
    %35 = vector.shape_cast %34 : vector<1x1x128xf32> to vector<1x128xf32>
    %cst_22 = arith.constant dense<0.000000e+00> : vector<128xf32>
    %36 = vector.multi_reduction <add>, %21, %cst_22 [0] : vector<2x128xf32> to vector<128xf32>
    %37 = vector.shape_cast %36 : vector<128xf32> to vector<1x128xf32>
    %38 = arith.addf %35, %37 : vector<1x128xf32>
    %c0_23 = arith.constant 0 : index
    %c0_24 = arith.constant 0 : index
    %c0_25 = arith.constant 0 : index
    %39 = vector.load %arg7[%c0_23, %c0_24, %c0_25] : memref<4x1x128xf32, #tpu.memory_space<vmem>>, vector<1x1x128xf32>
    %40 = vector.shape_cast %39 : vector<1x1x128xf32> to vector<1x128xf32>
    %41 = vector.shape_cast %38 : vector<1x128xf32> to vector<1x1x128xf32>
    tpu.vector_store %arg7[%c0_23, %c0_24, %c0_25], %41 {strides = array<i32>} : memref<4x1x128xf32, #tpu.memory_space<vmem>>, vector<1x1x128xf32>,
    %c0_26 = arith.constant 0 : index
    %c0_27 = arith.constant 0 : index
    %c0_28 = arith.constant 0 : index
    %42 = vector.load %arg8[%c0_26, %c0_27, %c0_28] : memref<4x1x128xf32, #tpu.memory_space<vmem>>, vector<1x1x128xf32>
    %43 = vector.shape_cast %42 : vector<1x1x128xf32> to vector<1x128xf32>
    %44 = arith.extui %23 : vector<2x128xi1> to vector<2x128xi32>
    %45 = arith.sitofp %44 : vector<2x128xi32> to vector<2x128xf32>
    %cst_29 = arith.constant dense<0.000000e+00> : vector<128xf32>
    %46 = vector.multi_reduction <add>, %45, %cst_29 [0] : vector<2x128xf32> to vector<128xf32>
    %47 = vector.shape_cast %46 : vector<128xf32> to vector<1x128xf32>
    %48 = arith.addf %43, %47 : vector<1x128xf32>
    %c0_30 = arith.constant 0 : index
    %c0_31 = arith.constant 0 : index
    %c0_32 = arith.constant 0 : index
    %49 = vector.load %arg8[%c0_30, %c0_31, %c0_32] : memref<4x1x128xf32, #tpu.memory_space<vmem>>, vector<1x1x128xf32>
    %50 = vector.shape_cast %49 : vector<1x1x128xf32> to vector<1x128xf32>
    %51 = vector.shape_cast %48 : vector<1x128xf32> to vector<1x1x128xf32>
    tpu.vector_store %arg8[%c0_30, %c0_31, %c0_32], %51 {strides = array<i32>} : memref<4x1x128xf32, #tpu.memory_space<vmem>>, vector<1x1x128xf32>,
    %52 = vector.extract_strided_slice %12 {offsets = [1, 0, 0], sizes = [1, 2, 128], strides = [1, 1, 1]} : vector<4x2x128xf32> to vector<1x2x128xf32>
    %53 = vector.shape_cast %52 : vector<1x2x128xf32> to vector<2x128xf32>
    %54 = arith.mulf %53, %18 : vector<2x128xf32>
    %c1_i32 = arith.constant 1 : i32
    %55 = vector.broadcast %c1_i32 : i32 to vector<2x128xi32>
    %56 = arith.cmpi eq, %7, %55 : vector<2x128xi32>
    %c1 = arith.constant 1 : index
    %c0_33 = arith.constant 0 : index
    %c0_34 = arith.constant 0 : index
    %57 = vector.load %arg6[%c1, %c0_33, %c0_34] : memref<4x1x128xf32, #tpu.memory_space<vmem>>, vector<1x1x128xf32>
    %58 = vector.shape_cast %57 : vector<1x1x128xf32> to vector<1x128xf32>
    %cst_35 = arith.constant 0.000000e+00 : f32
    %59 = vector.broadcast %cst_35 : f32 to vector<2x128xf32>
    %60 = arith.select %56, %54, %59 : vector<2x128xi1>, vector<2x128xf32>
    %cst_36 = arith.constant dense<0.000000e+00> : vector<128xf32>
    %61 = vector.multi_reduction <add>, %60, %cst_36 [0] : vector<2x128xf32> to vector<128xf32>
    %62 = vector.shape_cast %61 : vector<128xf32> to vector<1x128xf32>
    %63 = arith.addf %58, %62 : vector<1x128xf32>
    %c1_37 = arith.constant 1 : index
    %c0_38 = arith.constant 0 : index
    %c0_39 = arith.constant 0 : index
    %64 = vector.load %arg6[%c1_37, %c0_38, %c0_39] : memref<4x1x128xf32, #tpu.memory_space<vmem>>, vector<1x1x128xf32>
    %65 = vector.shape_cast %64 : vector<1x1x128xf32> to vector<1x128xf32>
    %66 = vector.shape_cast %63 : vector<1x128xf32> to vector<1x1x128xf32>
    tpu.vector_store %arg6[%c1_37, %c0_38, %c0_39], %66 {strides = array<i32>} : memref<4x1x128xf32, #tpu.memory_space<vmem>>, vector<1x1x128xf32>,
    %c1_40 = arith.constant 1 : index
    %c0_41 = arith.constant 0 : index
    %c0_42 = arith.constant 0 : index
    %67 = vector.load %arg7[%c1_40, %c0_41, %c0_42] : memref<4x1x128xf32, #tpu.memory_space<vmem>>, vector<1x1x128xf32>
    %68 = vector.shape_cast %67 : vector<1x1x128xf32> to vector<1x128xf32>
    %cst_43 = arith.constant dense<0.000000e+00> : vector<128xf32>
    %69 = vector.multi_reduction <add>, %54, %cst_43 [0] : vector<2x128xf32> to vector<128xf32>
    %70 = vector.shape_cast %69 : vector<128xf32> to vector<1x128xf32>
    %71 = arith.addf %68, %70 : vector<1x128xf32>
    %c1_44 = arith.constant 1 : index
    %c0_45 = arith.constant 0 : index
    %c0_46 = arith.constant 0 : index
    %72 = vector.load %arg7[%c1_44, %c0_45, %c0_46] : memref<4x1x128xf32, #tpu.memory_space<vmem>>, vector<1x1x128xf32>
    %73 = vector.shape_cast %72 : vector<1x1x128xf32> to vector<1x128xf32>
    %74 = vector.shape_cast %71 : vector<1x128xf32> to vector<1x1x128xf32>
    tpu.vector_store %arg7[%c1_44, %c0_45, %c0_46], %74 {strides = array<i32>} : memref<4x1x128xf32, #tpu.memory_space<vmem>>, vector<1x1x128xf32>,
    %c1_47 = arith.constant 1 : index
    %c0_48 = arith.constant 0 : index
    %c0_49 = arith.constant 0 : index
    %75 = vector.load %arg8[%c1_47, %c0_48, %c0_49] : memref<4x1x128xf32, #tpu.memory_space<vmem>>, vector<1x1x128xf32>
    %76 = vector.shape_cast %75 : vector<1x1x128xf32> to vector<1x128xf32>
    %77 = arith.extui %56 : vector<2x128xi1> to vector<2x128xi32>
    %78 = arith.sitofp %77 : vector<2x128xi32> to vector<2x128xf32>
    %cst_50 = arith.constant dense<0.000000e+00> : vector<128xf32>
    %79 = vector.multi_reduction <add>, %78, %cst_50 [0] : vector<2x128xf32> to vector<128xf32>
    %80 = vector.shape_cast %79 : vector<128xf32> to vector<1x128xf32>
    %81 = arith.addf %76, %80 : vector<1x128xf32>
    %c1_51 = arith.constant 1 : index
    %c0_52 = arith.constant 0 : index
    %c0_53 = arith.constant 0 : index
    %82 = vector.load %arg8[%c1_51, %c0_52, %c0_53] : memref<4x1x128xf32, #tpu.memory_space<vmem>>, vector<1x1x128xf32>
    %83 = vector.shape_cast %82 : vector<1x1x128xf32> to vector<1x128xf32>
    %84 = vector.shape_cast %81 : vector<1x128xf32> to vector<1x1x128xf32>
    tpu.vector_store %arg8[%c1_51, %c0_52, %c0_53], %84 {strides = array<i32>} : memref<4x1x128xf32, #tpu.memory_space<vmem>>, vector<1x1x128xf32>,
    %85 = vector.extract_strided_slice %12 {offsets = [2, 0, 0], sizes = [1, 2, 128], strides = [1, 1, 1]} : vector<4x2x128xf32> to vector<1x2x128xf32>
    %86 = vector.shape_cast %85 : vector<1x2x128xf32> to vector<2x128xf32>
    %87 = arith.mulf %86, %18 : vector<2x128xf32>
    %c2_i32 = arith.constant 2 : i32
    %88 = vector.broadcast %c2_i32 : i32 to vector<2x128xi32>
    %89 = arith.cmpi eq, %7, %88 : vector<2x128xi32>
    %c2 = arith.constant 2 : index
    %c0_54 = arith.constant 0 : index
    %c0_55 = arith.constant 0 : index
    %90 = vector.load %arg6[%c2, %c0_54, %c0_55] : memref<4x1x128xf32, #tpu.memory_space<vmem>>, vector<1x1x128xf32>
    %91 = vector.shape_cast %90 : vector<1x1x128xf32> to vector<1x128xf32>
    %cst_56 = arith.constant 0.000000e+00 : f32
    %92 = vector.broadcast %cst_56 : f32 to vector<2x128xf32>
    %93 = arith.select %89, %87, %92 : vector<2x128xi1>, vector<2x128xf32>
    %cst_57 = arith.constant dense<0.000000e+00> : vector<128xf32>
    %94 = vector.multi_reduction <add>, %93, %cst_57 [0] : vector<2x128xf32> to vector<128xf32>
    %95 = vector.shape_cast %94 : vector<128xf32> to vector<1x128xf32>
    %96 = arith.addf %91, %95 : vector<1x128xf32>
    %c2_58 = arith.constant 2 : index
    %c0_59 = arith.constant 0 : index
    %c0_60 = arith.constant 0 : index
    %97 = vector.load %arg6[%c2_58, %c0_59, %c0_60] : memref<4x1x128xf32, #tpu.memory_space<vmem>>, vector<1x1x128xf32>
    %98 = vector.shape_cast %97 : vector<1x1x128xf32> to vector<1x128xf32>
    %99 = vector.shape_cast %96 : vector<1x128xf32> to vector<1x1x128xf32>
    tpu.vector_store %arg6[%c2_58, %c0_59, %c0_60], %99 {strides = array<i32>} : memref<4x1x128xf32, #tpu.memory_space<vmem>>, vector<1x1x128xf32>,
    %c2_61 = arith.constant 2 : index
    %c0_62 = arith.constant 0 : index
    %c0_63 = arith.constant 0 : index
    %100 = vector.load %arg7[%c2_61, %c0_62, %c0_63] : memref<4x1x128xf32, #tpu.memory_space<vmem>>, vector<1x1x128xf32>
    %101 = vector.shape_cast %100 : vector<1x1x128xf32> to vector<1x128xf32>
    %cst_64 = arith.constant dense<0.000000e+00> : vector<128xf32>
    %102 = vector.multi_reduction <add>, %87, %cst_64 [0] : vector<2x128xf32> to vector<128xf32>
    %103 = vector.shape_cast %102 : vector<128xf32> to vector<1x128xf32>
    %104 = arith.addf %101, %103 : vector<1x128xf32>
    %c2_65 = arith.constant 2 : index
    %c0_66 = arith.constant 0 : index
    %c0_67 = arith.constant 0 : index
    %105 = vector.load %arg7[%c2_65, %c0_66, %c0_67] : memref<4x1x128xf32, #tpu.memory_space<vmem>>, vector<1x1x128xf32>
    %106 = vector.shape_cast %105 : vector<1x1x128xf32> to vector<1x128xf32>
    %107 = vector.shape_cast %104 : vector<1x128xf32> to vector<1x1x128xf32>
    tpu.vector_store %arg7[%c2_65, %c0_66, %c0_67], %107 {strides = array<i32>} : memref<4x1x128xf32, #tpu.memory_space<vmem>>, vector<1x1x128xf32>,
    %c2_68 = arith.constant 2 : index
    %c0_69 = arith.constant 0 : index
    %c0_70 = arith.constant 0 : index
    %108 = vector.load %arg8[%c2_68, %c0_69, %c0_70] : memref<4x1x128xf32, #tpu.memory_space<vmem>>, vector<1x1x128xf32>
    %109 = vector.shape_cast %108 : vector<1x1x128xf32> to vector<1x128xf32>
    %110 = arith.extui %89 : vector<2x128xi1> to vector<2x128xi32>
    %111 = arith.sitofp %110 : vector<2x128xi32> to vector<2x128xf32>
    %cst_71 = arith.constant dense<0.000000e+00> : vector<128xf32>
    %112 = vector.multi_reduction <add>, %111, %cst_71 [0] : vector<2x128xf32> to vector<128xf32>
    %113 = vector.shape_cast %112 : vector<128xf32> to vector<1x128xf32>
    %114 = arith.addf %109, %113 : vector<1x128xf32>
    %c2_72 = arith.constant 2 : index
    %c0_73 = arith.constant 0 : index
    %c0_74 = arith.constant 0 : index
    %115 = vector.load %arg8[%c2_72, %c0_73, %c0_74] : memref<4x1x128xf32, #tpu.memory_space<vmem>>, vector<1x1x128xf32>
    %116 = vector.shape_cast %115 : vector<1x1x128xf32> to vector<1x128xf32>
    %117 = vector.shape_cast %114 : vector<1x128xf32> to vector<1x1x128xf32>
    tpu.vector_store %arg8[%c2_72, %c0_73, %c0_74], %117 {strides = array<i32>} : memref<4x1x128xf32, #tpu.memory_space<vmem>>, vector<1x1x128xf32>,
    %118 = vector.extract_strided_slice %12 {offsets = [3, 0, 0], sizes = [1, 2, 128], strides = [1, 1, 1]} : vector<4x2x128xf32> to vector<1x2x128xf32>
    %119 = vector.shape_cast %118 : vector<1x2x128xf32> to vector<2x128xf32>
    %120 = arith.mulf %119, %18 : vector<2x128xf32>
    %c3_i32 = arith.constant 3 : i32
    %121 = vector.broadcast %c3_i32 : i32 to vector<2x128xi32>
    %122 = arith.cmpi eq, %7, %121 : vector<2x128xi32>
    %c3 = arith.constant 3 : index
    %c0_75 = arith.constant 0 : index
    %c0_76 = arith.constant 0 : index
    %123 = vector.load %arg6[%c3, %c0_75, %c0_76] : memref<4x1x128xf32, #tpu.memory_space<vmem>>, vector<1x1x128xf32>
    %124 = vector.shape_cast %123 : vector<1x1x128xf32> to vector<1x128xf32>
    %cst_77 = arith.constant 0.000000e+00 : f32
    %125 = vector.broadcast %cst_77 : f32 to vector<2x128xf32>
    %126 = arith.select %122, %120, %125 : vector<2x128xi1>, vector<2x128xf32>
    %cst_78 = arith.constant dense<0.000000e+00> : vector<128xf32>
    %127 = vector.multi_reduction <add>, %126, %cst_78 [0] : vector<2x128xf32> to vector<128xf32>
    %128 = vector.shape_cast %127 : vector<128xf32> to vector<1x128xf32>
    %129 = arith.addf %124, %128 : vector<1x128xf32>
    %c3_79 = arith.constant 3 : index
    %c0_80 = arith.constant 0 : index
    %c0_81 = arith.constant 0 : index
    %130 = vector.load %arg6[%c3_79, %c0_80, %c0_81] : memref<4x1x128xf32, #tpu.memory_space<vmem>>, vector<1x1x128xf32>
    %131 = vector.shape_cast %130 : vector<1x1x128xf32> to vector<1x128xf32>
    %132 = vector.shape_cast %129 : vector<1x128xf32> to vector<1x1x128xf32>
    tpu.vector_store %arg6[%c3_79, %c0_80, %c0_81], %132 {strides = array<i32>} : memref<4x1x128xf32, #tpu.memory_space<vmem>>, vector<1x1x128xf32>,
    %c3_82 = arith.constant 3 : index
    %c0_83 = arith.constant 0 : index
    %c0_84 = arith.constant 0 : index
    %133 = vector.load %arg7[%c3_82, %c0_83, %c0_84] : memref<4x1x128xf32, #tpu.memory_space<vmem>>, vector<1x1x128xf32>
    %134 = vector.shape_cast %133 : vector<1x1x128xf32> to vector<1x128xf32>
    %cst_85 = arith.constant dense<0.000000e+00> : vector<128xf32>
    %135 = vector.multi_reduction <add>, %120, %cst_85 [0] : vector<2x128xf32> to vector<128xf32>
    %136 = vector.shape_cast %135 : vector<128xf32> to vector<1x128xf32>
    %137 = arith.addf %134, %136 : vector<1x128xf32>
    %c3_86 = arith.constant 3 : index
    %c0_87 = arith.constant 0 : index
    %c0_88 = arith.constant 0 : index
    %138 = vector.load %arg7[%c3_86, %c0_87, %c0_88] : memref<4x1x128xf32, #tpu.memory_space<vmem>>, vector<1x1x128xf32>
    %139 = vector.shape_cast %138 : vector<1x1x128xf32> to vector<1x128xf32>
    %140 = vector.shape_cast %137 : vector<1x128xf32> to vector<1x1x128xf32>
    tpu.vector_store %arg7[%c3_86, %c0_87, %c0_88], %140 {strides = array<i32>} : memref<4x1x128xf32, #tpu.memory_space<vmem>>, vector<1x1x128xf32>,
    %c3_89 = arith.constant 3 : index
    %c0_90 = arith.constant 0 : index
    %c0_91 = arith.constant 0 : index
    %141 = vector.load %arg8[%c3_89, %c0_90, %c0_91] : memref<4x1x128xf32, #tpu.memory_space<vmem>>, vector<1x1x128xf32>
    %142 = vector.shape_cast %141 : vector<1x1x128xf32> to vector<1x128xf32>
    %143 = arith.extui %122 : vector<2x128xi1> to vector<2x128xi32>
    %144 = arith.sitofp %143 : vector<2x128xi32> to vector<2x128xf32>
    %cst_92 = arith.constant dense<0.000000e+00> : vector<128xf32>
    %145 = vector.multi_reduction <add>, %144, %cst_92 [0] : vector<2x128xf32> to vector<128xf32>
    %146 = vector.shape_cast %145 : vector<128xf32> to vector<1x128xf32>
    %147 = arith.addf %142, %146 : vector<1x128xf32>
    %c3_93 = arith.constant 3 : index
    %c0_94 = arith.constant 0 : index
    %c0_95 = arith.constant 0 : index
    %148 = vector.load %arg8[%c3_93, %c0_94, %c0_95] : memref<4x1x128xf32, #tpu.memory_space<vmem>>, vector<1x1x128xf32>
    %149 = vector.shape_cast %148 : vector<1x1x128xf32> to vector<1x128xf32>
    %150 = vector.shape_cast %147 : vector<1x128xf32> to vector<1x1x128xf32>
    tpu.vector_store %arg8[%c3_93, %c0_94, %c0_95], %150 {strides = array<i32>} : memref<4x1x128xf32, #tpu.memory_space<vmem>>, vector<1x1x128xf32>,
    %c0_i32_96 = arith.constant 0 : i32
    %151 = arith.cmpi eq, %arg2, %c0_i32_96 : i32
    %152 = arith.extui %151 : i1 to i32
    %c0_i32_97 = arith.constant 0 : i32
    %153 = arith.cmpi ne, %152, %c0_i32_97 : i32
    scf.if %153 {
      %c0_98 = arith.constant 0 : index
      %c0_99 = arith.constant 0 : index
      %c0_100 = arith.constant 0 : index
      %154 = vector.load %arg6[%c0_98, %c0_99, %c0_100] : memref<4x1x128xf32, #tpu.memory_space<vmem>>, vector<4x1x128xf32>
      %cst_101 = arith.constant dense<0.000000e+00> : vector<4x1xf32>
      %155 = vector.multi_reduction <add>, %154, %cst_101 [2] : vector<4x1x128xf32> to vector<4x1xf32>
      %cst_102 = arith.constant dense<0.000000e+00> : vector<4xf32>
      %156 = vector.multi_reduction <add>, %155, %cst_102 [1] : vector<4x1xf32> to vector<4xf32>
      %157 = vector.shape_cast %156 : vector<4xf32> to vector<4x1xf32>
      %c0_103 = arith.constant 0 : index
      %c0_104 = arith.constant 0 : index
      %c0_105 = arith.constant 0 : index
      %158 = vector.load %arg7[%c0_103, %c0_104, %c0_105] : memref<4x1x128xf32, #tpu.memory_space<vmem>>, vector<4x1x128xf32>
      %cst_106 = arith.constant dense<0.000000e+00> : vector<4x1xf32>
      %159 = vector.multi_reduction <add>, %158, %cst_106 [2] : vector<4x1x128xf32> to vector<4x1xf32>
      %cst_107 = arith.constant dense<0.000000e+00> : vector<4xf32>
      %160 = vector.multi_reduction <add>, %159, %cst_107 [1] : vector<4x1xf32> to vector<4xf32>
      %161 = vector.shape_cast %160 : vector<4xf32> to vector<4x1xf32>
      %c0_108 = arith.constant 0 : index
      %c0_109 = arith.constant 0 : index
      %c0_110 = arith.constant 0 : index
      %162 = vector.load %arg8[%c0_108, %c0_109, %c0_110] : memref<4x1x128xf32, #tpu.memory_space<vmem>>, vector<4x1x128xf32>
      %cst_111 = arith.constant dense<0.000000e+00> : vector<4x1xf32>
      %163 = vector.multi_reduction <add>, %162, %cst_111 [2] : vector<4x1x128xf32> to vector<4x1xf32>
      %cst_112 = arith.constant dense<0.000000e+00> : vector<4xf32>
      %164 = vector.multi_reduction <add>, %163, %cst_112 [1] : vector<4x1xf32> to vector<4xf32>
      %165 = vector.shape_cast %164 : vector<4xf32> to vector<4x1xf32>
      %cst_113 = arith.constant 2.000000e+00 : f32
      %166 = vector.broadcast %cst_113 : f32 to vector<4x1xf32>
      %167 = arith.mulf %166, %157 : vector<4x1xf32>
      %cst_114 = arith.constant 9.99999974E-6 : f32
      %168 = vector.broadcast %cst_114 : f32 to vector<4x1xf32>
      %169 = arith.addf %167, %168 : vector<4x1xf32>
      %170 = arith.addf %161, %165 : vector<4x1xf32>
      %cst_115 = arith.constant 9.99999974E-6 : f32
      %171 = vector.broadcast %cst_115 : f32 to vector<4x1xf32>
      %172 = arith.addf %170, %171 : vector<4x1xf32>
      %173 = arith.divf %169, %172 : vector<4x1xf32>
      %cst_116 = arith.constant 1.000000e+00 : f32
      %174 = vector.broadcast %cst_116 : f32 to vector<4x1xf32>
      %175 = arith.subf %174, %173 : vector<4x1xf32>
      %176 = vector.shape_cast %175 : vector<4x1xf32> to vector<1x4x1xf32>
      %cst_117 = arith.constant dense<0.000000e+00> : vector<1xf32>
      %177 = vector.multi_reduction <add>, %176, %cst_117 [1, 2] : vector<1x4x1xf32> to vector<1xf32>
      %178 = vector.shape_cast %177 : vector<1xf32> to vector<1x1x1xf32>
      %179 = vector.extract %178[0, 0, 0] : f32 from vector<1x1x1xf32>
      %cst_118 = arith.constant 4.000000e+00 : f32
      %180 = arith.divf %179, %cst_118 : f32
      %181 = vector.broadcast %180 : f32 to vector<1x1x8x128xf32>
      %c0_119 = arith.constant 0 : index
      %c0_120 = arith.constant 0 : index
      %c0_121 = arith.constant 0 : index
      %c0_122 = arith.constant 0 : index
      %182 = vector.load %arg5[%c0_119, %c0_120, %c0_121, %c0_122] : memref<1x1x8x128xf32, #tpu.memory_space<vmem>>, vector<1x1x8x128xf32>
      tpu.vector_store %arg5[%c0_119, %c0_120, %c0_121, %c0_122], %181 {strides = array<i32>} : memref<1x1x8x128xf32, #tpu.memory_space<vmem>>, vector<1x1x8x128xf32>,
    } else {
    }
    return
  }
  func.func @transform_0(%arg0: i32, %arg1: i32, %arg2: i32) -> (i32, i32, i32, i32, i32) {
    %c0_i32 = arith.constant 0 : i32
    %c0_i32_0 = arith.constant 0 : i32
    %c0_i32_1 = arith.constant 0 : i32
    return %arg1, %arg0, %c0_i32, %arg2, %c0_i32_0 : i32, i32, i32, i32, i32
  }
  func.func @transform_1(%arg0: i32, %arg1: i32, %arg2: i32) -> (i32, i32, i32) {
    %c0_i32 = arith.constant 0 : i32
    %c0_i32_0 = arith.constant 0 : i32
    return %arg1, %arg2, %c0_i32 : i32, i32, i32
  }
  func.func @transform_2(%arg0: i32, %arg1: i32, %arg2: i32) -> (i32, i32, i32, i32) {
    %c0_i32 = arith.constant 0 : i32
    %c0_i32_0 = arith.constant 0 : i32
    %c0_i32_1 = arith.constant 0 : i32
    return %arg0, %arg1, %c0_i32, %c0_i32_0 : i32, i32, i32, i32
  }
}

</mosaic_0001>

<bundles_post_ra>
// kernel: tpu_custom_call.1
= control target key start
LH: loop header
LB: loop body
LE: loop exit
PB: predicated region body
PF: predicated region fallthrough
CT: control target
= control target key end

     0   :  { %7 = vsyncpa [#allocation6], 0  ;;  %s1186_s0 = inlined_call_operand.hbm [shape: f32[2,3,4,2,128], index: 0, kind: input, shape index: {}]   ;;  %s1187_s1 = inlined_call_operand.vmem [shape: s8[2,2,128], index: 1, kind: input, shape index: {}]   ;;  %s1188_s2 = inlined_call_operand.hbm [shape: f32[3,2,8,128], index: 2, kind: output, shape index: {}]  }
   0x1   :  { %9 = vsyncpa [#allocation6 + $0x1], 0 }
   0x2   :  { %10 = vsyncpa [#allocation7], 0 }
   0x3   :  { %12 = vsyncpa [#allocation7 + $0x1], 0  ;;  %s928_s9 = smov 0   ;;  %s930_s10 = smov 0  }
   0x4   :  { %s932_s11 = smov 0   ;;  %s934_s12 = smov 0  }
   0x5   :  { %s936_s13 = smov 0   ;;  %s938_s14 = smov 0  }
   0x6   :  { %s940_s15 = smov 0   ;;  %s942_s16 = smov 0  }
   0x7 LB: > { %s657_s17 = sadd.s32 4294967295, %s906_s16   ;;  %s658_s18 = sadd.s32 4294967294, %s906_s16   ;;  %s906_s16 = sphi %s942_s16, %s18_s16   ;;  %s902_s15 = sphi %s940_s15, %s1203_s15   ;;  %s898_s14 = sphi %s938_s14, %s1202_s14   ;;  %s894_s13 = sphi %s936_s13, %s1201_s13   ;;  %s890_s12 = sphi %s934_s12, %s1200_s12   ;;  %s886_s11 = sphi %s932_s11, %s1199_s11   ;;  %s882_s10 = sphi %s930_s10, %s1198_s10   ;;  %s878_s9 = sphi %s928_s9, %s1197_s9  }
   0x8   : > { %s33_s19 = sadd.s32 1, %s898_s14  ;;  %s37_s20 = sadd.s32 1, %s902_s15 }
   0x9   : > { %p35_p0 = scmp.ge.s32.totalorder %s33_s19, 2  ;;  %s48_s21 = sadd.s32 1, %s886_s11 }
   0xa   : > { %p55_p1 = scmp.ne.s32.totalorder %s886_s11, %s882_s10  ;;  %p56_p2 = scmp.eq.s32.totalorder %s906_s16, 0 }
   0xb   : > { %s1205_s19 = smov (%p35_p0, %s33_s19), 0  ;;  %s1207_s20 = smov (!%p35_p0, %s37_s20), %s902_s15 }
   0xc   : > { %s41_s22 = ssub.s32 %s898_s14, %s1205_s19  ;;  %p981_p3 = por %p56_p2, %p55_p1 }
   0xd   : > { %p39_p4 = scmp.ge.s32.totalorder %s1207_s20, 3  ;;  %p61_p5 = scmp.ne.s32.totalorder %s882_s10, %s878_s9 }
   0xe   : > { %p62_p6 = scmp.eq.s32.totalorder %s657_s17, 0  ;;  %p115_p7 = scmp.eq.s32.totalorder %s657_s17, 5 }
   0xf   : > { %s1209_s20 = smov (%p39_p4, %s1207_s20), 0  ;;  %p121_p10 = scmp.eq.s32.totalorder %s658_s18, 5 }
  0x10   : > { %p989_p8 = por %p62_p6, %p61_p5  ;;  %p993_p9 = por %p115_p7, %p55_p1 }
  0x11   : > { %s42_s26 = ssub.s32 %s902_s15, %s1209_s20  ;;  %p999_p12 = por %p121_p10, %p61_p5 }
  0x12   : > { %s1192_s25 = scalar_select %p993_p9, 1, 0 }
  0x13   : > { %s43_s27 = sor.u32 %s42_s26, %s41_s22  ;;  %p691_p13 = scmp.lt.s32.totalorder %s906_s16, 6 }
  0x14   : > { %p46_p11 = scmp.eq.s32.totalorder %s43_s27, 0  ;;  %s141_s29 = sand.u32 1, %s886_s11  }
  0x15   : > { %s1193_s28 = scalar_select %p999_p12, 1, 0 }
  0x16   : > { %s1006_s30 = scalar_select %p46_p11, %s886_s11, %s48_s21  }
  0x17   : > { %s661_s3 = sshll.u32 %s141_s29, 3  ;;  %s662_s4 = sshll.u32 %s902_s15, 2 }
  0x18   : > { %s676_s5 = smul.u32 12, %s898_s14  ;;  %s145_s6 = scalar_lea.vmem [#allocation5], %s661_s3 }
  0x19   : > { %s155_s7 = sshll.u32 %s145_s6, 4  ;;  %p1014_p0 = pnand %p691_p13, %p981_p3  ;;  %s1010_s7 = int_to_ptr.vmem [resolvable:$true] %s155_s7 }
  0x1a   : > { %s152_s17 = sadd.s32 %s676_s5, %s662_s4  ;;  %s1023_s27 = scalar_lea.sflag [#allocation6], %s141_s29 }
  0x1b   : > { %s663_s18 = sshll.u32 %s152_s17, 5  ;;  %p780_p2 = pneg %p1014_p0 }
  0x1c   : > { %s1021_s21 = scalar_lea.hbm %s1186_s0, %s663_s18  ;;  %s783_s5 = scalar_lea.hbm %s1186_s0, 768 }
  0x1d   : > { %s778_s23 = scalar_lea.hbm %s1021_s21, 128  ;;  %p784_p5 = scmp.lt.u32.totalorder %s1021_s21, %s1186_s0 }
  0x1e   : > { %p779_p1 = scmp.ne.s32.totalorder %s1021_s21, %s778_s23  ;;  %p785_p6 = scmp.lt.u32.totalorder %s783_s5, %s778_s23 }
  0x1f   : > { %p787_p10 = scmp.lt.u32.totalorder %s778_s23, %s1021_s21 }
  0x20   : > { %p781_p3 = pnand %p780_p2, %p779_p1  ;;  %p786_p7 = por %p785_p6, %p784_p5 }
  0x22   : > { %p782_p4 = pneg %p781_p3  ;;  %p788_p11 = por %p787_p10, %p786_p7 }
  0x24   : > { %p789_p13 = pnand %p788_p11, %p782_p4 }
  0x26   : > { %792 = shalt.err (!%p789_p13)
}
  0x27   : > { %s793_s29 = scalar_lea.vmem %s1010_s7, 128  ;;  %s908_s18 = smov [#allocation5]  }
  0x28   : > { %p794_p1 = scmp.ne.s32.totalorder %s1010_s7, %s793_s29  ;;  %s798_s22 = sshll.u32 %s908_s18, 4  ;;  %s799_s22 = int_to_ptr.vmem [resolvable:$false] %s798_s22 }
  0x29   : > { %s800_s26 = scalar_lea.vmem %s799_s22, 256  ;;  %p801_p9 = scmp.lt.s32.totalorder %s1010_s7, %s799_s22 }
  0x2a   : > { %p796_p3 = pnand %p794_p1, %p780_p2  ;;  %p802_p5 = scmp.lt.s32.totalorder %s800_s26, %s793_s29 }
  0x2c   : > { %p797_p12 = pneg %p796_p3  ;;  %p803_p6 = por %p802_p5, %p801_p9 }
  0x2e   : > { %p804_p7 = pnand %p803_p6, %p797_p12 }
  0x30   : > { %807 = shalt.err (!%p804_p7)
}
  0x31   : > { %s909_s23 = smov 32   ;;  %s910_s3 = smov 2  }
  0x32   : > { %686 = dma.hbm_to_vmem [thread:$0]  (!%p1014_p0), %s1021_s21, 128, %s1010_s7, %s1023_s27, %s909_s23, %s909_s23, %s910_s3  }
  0x33   : > { %p664_p2 = scmp.ge.s32.totalorder %s906_s16, 1  ;;  %p172_p4 = scmp.lt.s32.totalorder %s906_s16, 7 }
  0x35   : > { %p173_p10 = pnand %p664_p2, %p172_p4 }
  0x36   : > { %s1054_s4 = sand.u32 (!%p173_p10), 1, %s882_s10  }
  0x37   : > { %176 = sbr.rel (%p173_p10) target bundleno = 536 (0x218), region = 28  ;;  %s665_s5 = sshll.u32 (!%p173_p10), %s1054_s4, 3 }
  0x38   : > { %s179_s6 = scalar_lea.sflag (!%p173_p10), [#allocation6], %s1054_s4  ;;  %s182_s17 = scalar_lea.vmem (!%p173_p10), [#allocation5], %s665_s5 }
  0x3e   : > { %869 = dma.done.wait (%p989_p8), %s179_s6, 128  }
  0x3f   : > { %871 = vsyncadd (%p989_p8), %s179_s6, 4294967168  ;;  %p209_p9 = scmp.lt.s32.totalorder %s890_s12, 1  ;;  %v911_v0 = vmov 0.0   ;;  %vm237_vm0 = vcmask 1041408   ;;  %v231_v2 = vld [vmem:[%s182_s17] sm:$0x3] }
  0x40   : > { %229 = vst [vmem:[#allocation4 + $0x2] sm:$0x1] %v911_v0  ;;  %219 = vst [vmem:[#allocation2] sm:$0x1] %v911_v0  ;;  %v232_v3 = vld [vmem:[%s182_s17 + $0x2] sm:$0x3] }
  0x41   : > { %220 = vst [vmem:[#allocation2 + $0x1] sm:$0x1] %v911_v0  ;;  %221 = vst [vmem:[#allocation2 + $0x2] sm:$0x1] %v911_v0  ;;  %s210_s24 = scalar_select %p209_p9, %s890_s12, 1  ;;  %v238_v7 = vsel %vm237_vm0, %v231_v2, -inf }
  0x42   : > { %222 = vst [vmem:[#allocation2 + $0x3] sm:$0x1] %v911_v0  ;;  %223 = vst [vmem:[#allocation3] sm:$0x1] %v911_v0  ;;  %v233_v5 = vld [vmem:[%s182_s17 + $0x4] sm:$0x3] }
  0x43   : > { %224 = vst [vmem:[#allocation3 + $0x1] sm:$0x1] %v911_v0  ;;  %225 = vst [vmem:[#allocation3 + $0x2] sm:$0x1] %v911_v0  ;;  %s214_s21 = scalar_lea.vmem %s1187_s1, %s210_s24  ;;  %v234_v6 = vld [vmem:[%s182_s17 + $0x6] sm:$0x3] }
  0x44   : > { %226 = vst [vmem:[#allocation3 + $0x3] sm:$0x1] %v911_v0  ;;  %227 = vst [vmem:[#allocation4] sm:$0x1] %v911_v0  ;;  %v235_v1 = vld [vmem:[%s214_s21] sm:$0x1] }
  0x45   : > { %228 = vst [vmem:[#allocation4 + $0x1] sm:$0x1] %v911_v0  ;;  %230 = vst [vmem:[#allocation4 + $0x3] sm:$0x1] %v911_v0  ;;  %v1071_v4 = vunpack.c.0.s8 %v235_v1  ;;  %v239_v8 = vsel %vm237_vm0, %v232_v3, -inf  ;;  %v240_v9 = vsel %vm237_vm0, %v233_v5, -inf }
  0x46   : > { %v241_v10 = vsel %vm237_vm0, %v234_v6, -inf  ;;  %v242_v11 = vmax.f32 %v238_v7, %v239_v8  ;;  %vm424_vm5 = vcmask 1040384   ;;  %vm514_vm6 = vcmask 1041409   ;;  %s672_s27 = sshll.u32 %s894_s13, 1  ;;  %s208_s18 = scalar_lea.vmem [#allocation8], %s665_s5 }
  0x47   : > { %vm342_vm1 = vcmp.eq.s32.totalorder %v1071_v4, 2  ;;  %vm304_vm2 = vcmp.eq.s32.totalorder %v1071_v4, 1  ;;  %v243_v14 = vmax.f32 %v240_v9, %v241_v10  ;;  %vm380_vm3 = vcmp.eq.s32.totalorder %v1071_v4, 3  ;;  %v367_v45 = vld [vmem:[#allocation4 + $0x2] sm:$0x1]  ;;  %s551_s29 = sadd.s32 %s890_s12, %s672_s27  ;;  %s555_s22 = sshll.u32 %s208_s18, 4  ;;  %s1134_s22 = int_to_ptr.vmem [resolvable:$true] %s555_s22 }
  0x48   : > { %v669_v12 = vsel %vm342_vm1, 1.0, %v911_v0  ;;  %v668_v13 = vsel %vm304_vm2, 1.0, %v911_v0  ;;  %vm269_vm4 = vcmp.eq.s32.totalorder %v1071_v4, 0  ;;  %v670_v20 = vsel %vm380_vm3, 1.0, %v911_v0  ;;  %s673_s26 = sshll.u32 %s551_s29, 7  ;;  %s540_s13 = scalar_lea.sflag [#allocation7], %s1054_s4 }
  0x49   : > { %v370_v15 = vsel %vm237_vm0, %v669_v12, 0.0  ;;  %v332_v16 = vsel %vm237_vm0, %v668_v13, 0.0  ;;  %v244_v19 = vmax.f32 %v242_v11, %v243_v14  ;;  %v408_v21 = vsel %vm237_vm0, %v670_v20, 0.0  ;;  %s1132_s24 = scalar_lea.hbm %s1188_s2, %s673_s26  ;;  %s808_s12 = scalar_lea.vmem %s1134_s22, 128 }
  0x4a   : > { %v371_v17 = vrot.slane %v370_v15, 4  ;;  %v333_v18 = vrot.slane %v332_v16, 4  ;;  %v667_v22 = vsel %vm269_vm4, 1.0, %v911_v0  ;;  %v409_v29 = vrot.slane %v408_v21, 4  ;;  %p809_p8 = scmp.ne.s32.totalorder %s1134_s22, %s808_s12  ;;  %p1195_p12 = scmp.ne.s32.totalorder %s1192_s25, 0 }
  0x4b   : > { %v245_v25 = vsub.f32 %v231_v2, %v244_v19  ;;  %v246_v26 = vsub.f32 %v232_v3, %v244_v19  ;;  %v247_v27 = vsub.f32 %v233_v5, %v244_v19  ;;  %v248_v28 = vsub.f32 %v234_v6, %v244_v19  ;;  %v291_v58 = vld [vmem:[#allocation4] sm:$0x1]  ;;  %s912_s5 = smov [#allocation8]  }
  0x4c   : > { %v372_v23 = vadd.f32 %v371_v17, %v370_v15  ;;  %v334_v24 = vadd.f32 %v333_v18, %v332_v16  ;;  %v294_v30 = vsel %vm237_vm0, %v667_v22, 0.0  ;;  %v410_v37 = vadd.f32 %v409_v29, %v408_v21  ;;  %v329_v46 = vld [vmem:[#allocation4 + $0x1] sm:$0x1]  ;;  %v405_v55 = vld [vmem:[#allocation4 + $0x3] sm:$0x1]  ;;  %p810_p0 = pnand %p809_p8, %p1195_p12  ;;  %s812_s7 = sshll.u32 %s912_s5, 4  ;;  %s813_s7 = int_to_ptr.vmem [resolvable:$false] %s812_s7 }
  0x4d   : > { %v249_v33 = vmul.f32 1.442695, %v245_v25  ;;  %v251_v34 = vmul.f32 1.442695, %v246_v26  ;;  %v253_v35 = vmul.f32 1.442695, %v247_v27  ;;  %p815_p13 = scmp.lt.s32.totalorder %s1134_s22, %s813_s7 }
  0x4e   : > { %v373_v31 = vrot.slane %v372_v23, 2  ;;  %v335_v32 = vrot.slane %v334_v24, 2  ;;  %v255_v36 = vmul.f32 1.442695, %v248_v28  ;;  %v295_v38 = vrot.slane %v294_v30, 4  ;;  %p811_p11 = pneg %p810_p0  ;;  %s814_s8 = scalar_lea.vmem %s813_s7, 256 }
  0x4f   : > { %760 = vpow2.f32 %v249_v33  ;;  %v411_v41 = vrot.slane %v410_v37, 2  ;;  %vm517_vm7 = vcmask 1042434   ;;  %vm520_vm8 = vcmask 1043459   ;;  %p816_p1 = scmp.lt.s32.totalorder %s814_s8, %s808_s12 }
  0x50   : > { %v374_v39 = vadd.f32 %v373_v31, %v372_v23  ;;  %v336_v40 = vadd.f32 %v335_v32, %v334_v24  ;;  %762 = vpow2.f32 %v251_v34  ;;  %v296_v42 = vadd.f32 %v295_v38, %v294_v30 }
  0x51   : > { %764 = vpow2.f32 %v253_v35  ;;  %v412_v47 = vadd.f32 %v411_v41, %v410_v37  ;;  %vm523_vm9 = vcmask 3072   ;;  %p817_p3 = por %p816_p1, %p815_p13 }
  0x52   : > { %v375_v43 = vrot.slane %v374_v39, 1  ;;  %v337_v44 = vrot.slane %v336_v40, 1  ;;  %766 = vpow2.f32 %v255_v36  ;;  %v297_v48 = vrot.slane %v296_v42, 2 }
  0x53   : > { %v413_v51 = vrot.slane %v412_v47, 1  ;;  %p818_p5 = pnand %p817_p3, %p811_p11 }
  0x54   : > { %v376_v49 = vadd.f32 %v375_v43, %v374_v39  ;;  %v338_v50 = vadd.f32 %v337_v44, %v336_v40  ;;  %v298_v52 = vadd.f32 %v297_v48, %v296_v42 }
  0x55   : > { %v414_v56 = vadd.f32 %v413_v51, %v412_v47 }
  0x56   : > { %v377_v53 = vadd.f32 %v376_v49, %v367_v45  ;;  %v339_v54 = vadd.f32 %v338_v50, %v329_v46  ;;  %v299_v57 = vrot.slane %v298_v52, 1 }
  0x57   : > { %v415_v59 = vadd.f32 %v414_v56, %v405_v55 }
  0x58   : > { %378 = vst [vmem:[#allocation4 + $0x2] sm:$0x1] %v377_v53  ;;  %340 = vst [vmem:[#allocation4 + $0x1] sm:$0x1] %v339_v54  ;;  %v300_v60 = vadd.f32 %v299_v57, %v298_v52  ;;  %v356_v53 = vld [vmem:[#allocation3 + $0x2] sm:$0x1] }
  0x59   : > { %v761_v61 = vpop.eup %760  ;;  %416 = vst [vmem:[#allocation4 + $0x3] sm:$0x1] %v415_v59  ;;  %v318_v54 = vld [vmem:[#allocation3 + $0x1] sm:$0x1] }
  0x5a   : > { %v763_v62 = vpop.eup %762  ;;  %v257_v63 = vsel %vm237_vm0, %v761_v61, 0.0  ;;  %v301_v0 = vadd.f32 %v300_v60, %v291_v58 }
  0x5b   : > { %v765_v1 = vpop.eup %764  ;;  %v258_v2 = vsel %vm237_vm0, %v763_v62, 0.0 }
  0x5c   : > { %v767_v3 = vpop.eup %766  ;;  %v259_v5 = vadd.f32 %v258_v2, %v257_v63  ;;  %v260_v6 = vsel %vm237_vm0, %v765_v1, 0.0  ;;  %302 = vst [vmem:[#allocation4] sm:$0x1] %v301_v0  ;;  %v281_v0 = vld [vmem:[#allocation3] sm:$0x1] }
  0x5d   : > { %v262_v7 = vsel %vm237_vm0, %v767_v3, 0.0 }
  0x5e   : > { %v261_v10 = vadd.f32 %v260_v6, %v259_v5 }
  0x5f   : > { %v463_v8 = vld [vmem:[#allocation4 + $0x2] sm:$0x1]  ;;  %v462_v9 = vld [vmem:[#allocation4 + $0x1] sm:$0x1] }
  0x60   : > { %v471_v11 = vsel %vm424_vm5, %v463_v8, 0.0  ;;  %v468_v12 = vsel %vm424_vm5, %v462_v9, 0.0  ;;  %v263_v13 = vadd.f32 %v262_v7, %v261_v10 }
  0x61   : > { %472 = vadd.xlane.f32.xlu1 %v471_v11  ;;  %469 = vadd.xlane.f32.xlu0 %v468_v12 }
  0x62   : > { %768 = vrcp.f32 %v263_v13 }
  0x6c   : > { %v769_v14 = vpop.eup %768 }
  0x6d   : > { %v265_v15 = vmul.f32 %v769_v14, %v263_v13 }
  0x6f   : > { %v266_v16 = vsub.f32 2.0, %v265_v15 }
  0x71   : > { %v267_v17 = vmul.f32 %v769_v14, %v266_v16 }
  0x73   : > { %v341_v18 = vmul.f32 %v765_v1, %v267_v17  ;;  %v303_v19 = vmul.f32 %v763_v62, %v267_v17  ;;  %v379_v20 = vmul.f32 %v767_v3, %v267_v17  ;;  %v268_v21 = vmul.f32 %v761_v61, %v267_v17  ;;  %v394_v61 = vld [vmem:[#allocation3 + $0x3] sm:$0x1] }
  0x75   : > { %v357_v22 = vsel %vm237_vm0, %v341_v18, 0.0  ;;  %v319_v23 = vsel %vm237_vm0, %v303_v19, 0.0  ;;  %v395_v24 = vsel %vm237_vm0, %v379_v20, 0.0  ;;  %v282_v25 = vsel %vm237_vm0, %v268_v21, 0.0 }
  0x76   : > { %v358_v26 = vrot.slane %v357_v22, 4  ;;  %v320_v27 = vrot.slane %v319_v23, 4  ;;  %v396_v28 = vrot.slane %v395_v24, 4  ;;  %v283_v29 = vrot.slane %v282_v25, 4 }
  0x77   : > { %v345_v30 = vsel %vm342_vm1, %v341_v18, 0.0  ;;  %v307_v31 = vsel %vm304_vm2, %v303_v19, 0.0  ;;  %v383_v32 = vsel %vm380_vm3, %v379_v20, 0.0  ;;  %v271_v33 = vsel %vm269_vm4, %v268_v21, 0.0  ;;  %v344_v18 = vld [vmem:[#allocation2 + $0x2] sm:$0x1] }
  0x78   : > { %v359_v34 = vadd.f32 %v358_v26, %v357_v22  ;;  %v321_v35 = vadd.f32 %v320_v27, %v319_v23  ;;  %v397_v36 = vadd.f32 %v396_v28, %v395_v24  ;;  %v284_v37 = vadd.f32 %v283_v29, %v282_v25  ;;  %v306_v23 = vld [vmem:[#allocation2 + $0x1] sm:$0x1]  ;;  %v382_v24 = vld [vmem:[#allocation2 + $0x3] sm:$0x1]  ;;  %v270_v25 = vld [vmem:[#allocation2] sm:$0x1] }
  0x79   : > { %v346_v38 = vsel %vm237_vm0, %v345_v30, 0.0  ;;  %v308_v39 = vsel %vm237_vm0, %v307_v31, 0.0  ;;  %v384_v40 = vsel %vm237_vm0, %v383_v32, 0.0  ;;  %v272_v41 = vsel %vm237_vm0, %v271_v33, 0.0 }
  0x7a   : > { %v360_v42 = vrot.slane %v359_v34, 2  ;;  %v322_v43 = vrot.slane %v321_v35, 2  ;;  %v398_v44 = vrot.slane %v397_v36, 2  ;;  %v285_v45 = vrot.slane %v284_v37, 2 }
  0x7b   : > { %v347_v46 = vrot.slane %v346_v38, 4  ;;  %v309_v47 = vrot.slane %v308_v39, 4  ;;  %v385_v4 = vrot.slane %v384_v40, 4  ;;  %v273_v48 = vrot.slane %v272_v41, 4 }
  0x7c   : > { %v361_v49 = vadd.f32 %v360_v42, %v359_v34  ;;  %v323_v50 = vadd.f32 %v322_v43, %v321_v35  ;;  %v399_v51 = vadd.f32 %v398_v44, %v397_v36  ;;  %v286_v52 = vadd.f32 %v285_v45, %v284_v37  ;;  %v464_v42 = vld [vmem:[#allocation4 + $0x3] sm:$0x1]  ;;  %v461_v43 = vld [vmem:[#allocation4] sm:$0x1] }
  0x7d   : > { %v348_v55 = vadd.f32 %v347_v46, %v346_v38  ;;  %v310_v56 = vadd.f32 %v309_v47, %v308_v39  ;;  %v386_v57 = vadd.f32 %v385_v4, %v384_v40  ;;  %v274_v58 = vadd.f32 %v273_v48, %v272_v41 }
  0x7e   : > { %v362_v59 = vrot.slane %v361_v49, 1  ;;  %v324_v60 = vrot.slane %v323_v50, 1  ;;  %v400_v62 = vrot.slane %v399_v51, 1  ;;  %v287_v63 = vrot.slane %v286_v52, 1 }
  0x7f   : > { %v349_v1 = vrot.slane %v348_v55, 2  ;;  %v311_v2 = vrot.slane %v310_v56, 2  ;;  %v387_v3 = vrot.slane %v386_v57, 2  ;;  %v275_v5 = vrot.slane %v274_v58, 2 }
  0x80   : > { %v363_v6 = vadd.f32 %v362_v59, %v361_v49  ;;  %v325_v7 = vadd.f32 %v324_v60, %v323_v50  ;;  %v401_v8 = vadd.f32 %v400_v62, %v399_v51  ;;  %v288_v9 = vadd.f32 %v287_v63, %v286_v52 }
  0x81   : > { %v350_v10 = vadd.f32 %v349_v1, %v348_v55  ;;  %v312_v11 = vadd.f32 %v311_v2, %v310_v56  ;;  %v388_v12 = vadd.f32 %v387_v3, %v386_v57  ;;  %v276_v13 = vadd.f32 %v275_v5, %v274_v58 }
  0x82   : > { %v364_v14 = vadd.f32 %v363_v6, %v356_v53  ;;  %v326_v15 = vadd.f32 %v325_v7, %v318_v54  ;;  %v402_v16 = vadd.f32 %v401_v8, %v394_v61  ;;  %v289_v17 = vadd.f32 %v288_v9, %v281_v0 }
  0x83   : > { %v351_v19 = vrot.slane %v350_v10, 1  ;;  %v313_v20 = vrot.slane %v312_v11, 1  ;;  %v389_v21 = vrot.slane %v388_v12, 1  ;;  %v277_v22 = vrot.slane %v276_v13, 1 }
  0x84   : > { %365 = vst [vmem:[#allocation3 + $0x2] sm:$0x1] %v364_v14  ;;  %327 = vst [vmem:[#allocation3 + $0x1] sm:$0x1] %v326_v15  ;;  %v474_v44 = vsel %vm424_vm5, %v464_v42, 0.0  ;;  %v465_v45 = vsel %vm424_vm5, %v461_v43, 0.0 }
  0x85   : > { %403 = vst [vmem:[#allocation3 + $0x3] sm:$0x1] %v402_v16  ;;  %290 = vst [vmem:[#allocation3] sm:$0x1] %v289_v17  ;;  %v352_v26 = vadd.f32 %v351_v19, %v350_v10  ;;  %v314_v27 = vadd.f32 %v313_v20, %v312_v11  ;;  %v390_v28 = vadd.f32 %v389_v21, %v388_v12 }
  0x86   : > { %v278_v29 = vadd.f32 %v277_v22, %v276_v13 }
  0x87   : > { %v353_v30 = vadd.f32 %v352_v26, %v344_v18  ;;  %v315_v31 = vadd.f32 %v314_v27, %v306_v23  ;;  %v391_v32 = vadd.f32 %v390_v28, %v382_v24 }
  0x88   : > { %v279_v33 = vadd.f32 %v278_v29, %v270_v25 }
  0x89   : > { %354 = vst [vmem:[#allocation2 + $0x2] sm:$0x1] %v353_v30  ;;  %316 = vst [vmem:[#allocation2 + $0x1] sm:$0x1] %v315_v31 }
  0x8a   : > { %392 = vst [vmem:[#allocation2 + $0x3] sm:$0x1] %v391_v32  ;;  %280 = vst [vmem:[#allocation2] sm:$0x1] %v279_v33 }
  0x8b   : > { %v443_v34 = vld [vmem:[#allocation3 + $0x2] sm:$0x1]  ;;  %v442_v35 = vld [vmem:[#allocation3 + $0x1] sm:$0x1] }
  0x8c   : > { %v444_v36 = vld [vmem:[#allocation3 + $0x3] sm:$0x1]  ;;  %v451_v37 = vsel %vm424_vm5, %v443_v34, 0.0  ;;  %v448_v38 = vsel %vm424_vm5, %v442_v35, 0.0  ;;  %v441_v39 = vld [vmem:[#allocation3] sm:$0x1] }
  0x8d   : > { %452 = vadd.xlane.f32.xlu1 %v451_v37  ;;  %449 = vadd.xlane.f32.xlu0 %v448_v38  ;;  %v454_v40 = vsel %vm424_vm5, %v444_v36, 0.0  ;;  %v445_v41 = vsel %vm424_vm5, %v441_v39, 0.0 }
  0x90   : > { %v422_v46 = vld [vmem:[#allocation2 + $0x2] sm:$0x1]  ;;  %v421_v47 = vld [vmem:[#allocation2 + $0x1] sm:$0x1] }
  0x91   : > { %455 = vadd.xlane.f32.xlu1 %v454_v40  ;;  %446 = vadd.xlane.f32.xlu0 %v445_v41  ;;  %v431_v4 = vsel %vm424_vm5, %v422_v46, 0.0  ;;  %v428_v48 = vsel %vm424_vm5, %v421_v47, 0.0  ;;  %v423_v49 = vld [vmem:[#allocation2 + $0x3] sm:$0x1]  ;;  %v420_v50 = vld [vmem:[#allocation2] sm:$0x1] }
  0x92   : > { %v434_v51 = vsel %vm424_vm5, %v423_v49, 0.0  ;;  %v425_v52 = vsel %vm424_vm5, %v420_v50, 0.0 }
  0x95   : > { %475 = vadd.xlane.f32.xlu1 %v474_v44  ;;  %466 = vadd.xlane.f32.xlu0 %v465_v45 }
  0x99   : > { %432 = vadd.xlane.f32.xlu1 %v431_v4  ;;  %429 = vadd.xlane.f32.xlu0 %v428_v48 }
  0x9d   : > { %435 = vadd.xlane.f32.xlu1 %v434_v51  ;;  %426 = vadd.xlane.f32.xlu0 %v425_v52 }
  0xee   : > { %v473_v53 = vpop.xlane.xlu1 %472  ;;  %v470_v54 = vpop.xlane.xlu0 %469 }
 0x11a   : > { %v453_v55 = vpop.xlane.xlu1 %452  ;;  %v450_v56 = vpop.xlane.xlu0 %449 }
 0x11b   : > { %v491_v57 = vadd.f32 %v473_v53, %v453_v55  ;;  %v490_v58 = vadd.f32 %v470_v54, %v450_v56 }
 0x11d   : > { %v495_v59 = vadd.f32 1e-05, %v491_v57  ;;  %v494_v60 = vadd.f32 1e-05, %v490_v58 }
 0x11e   : > { %v456_v61 = vpop.xlane.xlu1 %455  ;;  %v447_v62 = vpop.xlane.xlu0 %446 }
 0x11f   : > { %770 = vrcp.f32 %v494_v60 }
 0x120   : > { %772 = vrcp.f32 %v495_v59 }
 0x122   : > { %v476_v63 = vpop.xlane.xlu1 %475  ;;  %v467_v0 = vpop.xlane.xlu0 %466 }
 0x123   : > { %v492_v1 = vadd.f32 %v476_v63, %v456_v61  ;;  %v489_v2 = vadd.f32 %v467_v0, %v447_v62 }
 0x125   : > { %v496_v3 = vadd.f32 1e-05, %v492_v1  ;;  %v493_v5 = vadd.f32 1e-05, %v489_v2 }
 0x126   : > { %v433_v6 = vpop.xlane.xlu1 %432  ;;  %v430_v7 = vpop.xlane.xlu0 %429 }
 0x127   : > { %774 = vrcp.f32 %v496_v3  ;;  %v483_v8 = vmul.f32 2.0, %v433_v6  ;;  %v482_v9 = vmul.f32 2.0, %v430_v7 }
 0x128   : > { %776 = vrcp.f32 %v493_v5 }
 0x129   : > { %v486_v10 = vadd.f32 1e-05, %v482_v9  ;;  %v771_v11 = vpop.eup %770  ;;  %v487_v12 = vadd.f32 1e-05, %v483_v8 }
 0x12a   : > { %v436_v13 = vpop.xlane.xlu1 %435  ;;  %v427_v14 = vpop.xlane.xlu0 %426 }
 0x12b   : > { %v773_v15 = vpop.eup %772  ;;  %v484_v16 = vmul.f32 2.0, %v436_v13  ;;  %v481_v17 = vmul.f32 2.0, %v427_v14  ;;  %v500_v18 = vmul.f32 %v771_v11, %v486_v10 }
 0x12c   : > { %v502_v19 = vmul.f32 %v773_v15, %v487_v12 }
 0x12d   : > { %v488_v20 = vadd.f32 1e-05, %v484_v16  ;;  %v485_v21 = vadd.f32 1e-05, %v481_v17  ;;  %v506_v23 = vsub.f32 1.0, %v500_v18 }
 0x12e   : > { %v507_v25 = vsub.f32 1.0, %v502_v19 }
 0x12f   : > { %v513_v29 = vrot.slane %v506_v23, 7 }
 0x130   : > { %v516_v31 = vrot.slane %v507_v25, 6 }
 0x131   : > { %v775_v22 = vpop.eup %774 }
 0x132   : > { %v777_v24 = vpop.eup %776  ;;  %v504_v26 = vmul.f32 %v775_v22, %v488_v20 }
 0x133   : > { %v498_v27 = vmul.f32 %v777_v24, %v485_v21 }
 0x134   : > { %v508_v28 = vsub.f32 1.0, %v504_v26 }
 0x135   : > { %v505_v30 = vsub.f32 1.0, %v498_v27 }
 0x136   : > { %v519_v32 = vrot.slane %v508_v28, 5 }
 0x137   : > { %v515_v33 = vsel %vm514_vm6, %v513_v29, %v505_v30 }
 0x138   : > { %v518_v34 = vsel %vm517_vm7, %v516_v31, %v515_v33 }
 0x139   : > { %v521_v35 = vsel %vm520_vm8, %v519_v32, %v518_v34 }
 0x13a   : > { %v524_v36 = vsel %vm523_vm9, %v521_v35, 0.0 }
 0x13b   : > { %525 = vadd.xlane.f32.xlu0 %v524_v36 }
 0x1c8   : > { %v526_v37 = vpop.xlane.xlu0 %525 }
 0x1c9   : > { %v527_v38 = vrot.slane %v526_v37, 4 }
 0x1cb   : > { %v528_v39 = vadd.f32 %v527_v38, %v526_v37 }
 0x1cd   : > { %v529_v40 = vrot.slane %v528_v39, 2 }
 0x1cf   : > { %v530_v41 = vadd.f32 %v529_v40, %v528_v39 }
 0x1d1   : > { %v531_v42 = vrot.slane %v530_v41, 1 }
 0x1d3   : > { %v532_v43 = vadd.f32 %v531_v42, %v530_v41 }
 0x1d5   : > { %677 = vpush %v532_v43 }
 0x206   : > { %s678_s23 = spop %677 }
 0x207   : > { %s536_s3 = smul.f32 0.25, %s678_s23 }
 0x209   : > { %v537_v44 = vstv %s536_s3 }
 0x20a   : > { %538 = vst [vmem:[%s208_s18] sm:$0xff] %v537_v44 }
 0x20b   : > { %821 = shalt.err (!%p818_p5)
}
 0x20c   : > { %s822_s4 = scalar_lea.hbm %s1132_s24, 128  ;;  %s826_s29 = scalar_lea.hbm %s1188_s2, 768 }
 0x20d   : > { %p823_p6 = scmp.ne.s32.totalorder %s1132_s24, %s822_s4  ;;  %p827_p4 = scmp.lt.u32.totalorder %s1132_s24, %s1188_s2 }
 0x20e   : > { %p828_p10 = scmp.lt.u32.totalorder %s826_s29, %s822_s4  ;;  %p830_p8 = scmp.lt.u32.totalorder %s822_s4, %s1132_s24 }
 0x20f   : > { %p824_p7 = pnand %p823_p6, %p1195_p12 }
 0x210   : > { %p829_p9 = por %p828_p10, %p827_p4 }
 0x211   : > { %p825_p2 = pneg %p824_p7 }
 0x212   : > { %p831_p0 = por %p830_p8, %p829_p9 }
 0x214   : > { %p832_p11 = pnand %p831_p0, %p825_p2 }
 0x216   : > { %835 = shalt.err (!%p832_p11)
}
 0x217   : > { %681 = dma.vmem_to_hbm [thread:$0]  (%p1195_p12), %s1134_s22, 128, %s1132_s24, %s540_s13  }
 0x218 PF: > { %p692_p13 = scmp.ge.s32.totalorder %s906_s16, 2  ;;  %s567_s23 = sand.u32 1, %s878_s9  }
 0x219   : > { %p1196_p1 = scmp.ne.s32.totalorder %s1193_s28, 0  ;;  %s568_s3 = scalar_lea.sflag [#allocation7], %s567_s23 }
 0x21b   : > { %p688_p3 = pnand %p692_p13, %p1196_p1 }
 0x21d   : > { %873 = dma.done.wait (!%p688_p3), %s568_s3, 128  }
 0x21e   : > { %875 = vsyncadd (!%p688_p3), %s568_s3, 4294967168  ;;  %s18_s16 = sadd.s32 1, %s906_s16   ;;  %s1197_s9 = smov %s882_s10 }
 0x21f   : > { %p15_p5 = scmp.ge.s32.totalorder %s18_s16, 8   ;;  %s1198_s10 = smov %s886_s11 }
 0x220   : > { %s1199_s11 = smov %s1006_s30  ;;  %s1200_s12 = smov %s898_s14 }
 0x221   : > { %s1201_s13 = smov %s902_s15  ;;  %s1202_s14 = smov %s1205_s19 }
 0x222   : > { %s1203_s15 = smov %s1209_s20  ;;  %17 = sbr.rel (!%p15_p5) target bundleno = 7 (0x7), region = 93 }
 0x229   :  { %573 = vsyncpa [#allocation6], 1 }
 0x22a   :  { %575 = vsyncpa [#allocation6 + $0x1], 1 }
 0x22b   :  { %576 = vsyncpa [#allocation7], 1 }
 0x22c   :  { %578 = vsyncpa [#allocation7 + $0x1], 1 }

</bundles_post_ra>
